<compile_context>
chip_gen: v6e
topology: v6e:2x2x1
jax: 0.10.0
libtpu: 0.0.40
codegen_flags: <defaults>
</compile_context>

<pallas_src>
import functools

import jax
import jax.numpy as jnp
from jax.experimental import pallas as pl
from jax.experimental.pallas import tpu as pltpu

LANES = 128      # fused / padded lane width (must be >= fused hidden width)
SUBLANES = 8


def _round_up(x, m):
    return (x + m - 1) // m * m


def _slab_layout(state_dim, action_dim):
    """Row offsets of each packed parameter block inside the (rows, LANES) slab."""
    off = {}
    r = 0
    off["w1s"] = r; r += _round_up(state_dim, SUBLANES)    # layer-1 weight, state rows
    off["w1a"] = r; r += _round_up(action_dim, SUBLANES)   # layer-1 weight, action rows
    off["b1"] = r;  r += SUBLANES                          # fused layer-1 bias (1 row used)
    off["w2"] = r;  r += LANES                             # block-diagonal layer-2 weight
    off["b2"] = r;  r += SUBLANES
    off["w3"] = r;  r += LANES                             # block-diagonal layer-3 weight
    off["b3"] = r;  r += SUBLANES
    return off, r


def _twin_critic_kernel(state_ref, action_ref, slab_ref, out_ref, *,
                        layout, state_dim, action_dim):
    """Fused twin-critic MLP: both heads in one block-diagonal network."""
    state = state_ref[...]                                     # (B, state_dim)
    action = action_ref[...]                                   # (B, action_dim)

    # Static slices of the packed parameter slab (zero-cost Ref views).
    w1s = slab_ref[layout["w1s"]:layout["w1s"] + state_dim, :]   # (state_dim, 128)
    w1a = slab_ref[layout["w1a"]:layout["w1a"] + action_dim, :]  # (action_dim, 128)
    b1 = slab_ref[layout["b1"]:layout["b1"] + 1, :]              # (1, 128)
    w2 = slab_ref[layout["w2"]:layout["w2"] + LANES, :]          # (128, 128)
    b2 = slab_ref[layout["b2"]:layout["b2"] + 1, :]              # (1, 128)
    w3 = slab_ref[layout["w3"]:layout["w3"] + LANES, :]          # (128, 128)
    b3 = slab_ref[layout["b3"]:layout["b3"] + 1, :]              # (1, 128)

    # Layer 1: the concat([state, action]) is folded into a split-K matmul.
    h = (jnp.dot(state, w1s, preferred_element_type=jnp.float32)
         + jnp.dot(action, w1a, preferred_element_type=jnp.float32)
         + b1)
    h = jnp.maximum(h, 0.0)                                    # (B, 128), lanes >= c1 are 0

    # Layer 2: block-diagonal -> the two heads stay independent.
    h = jnp.maximum(jnp.dot(h, w2, preferred_element_type=jnp.float32) + b2, 0.0)

    # Layer 3: lane 0 = q1, lane 1 = q2, all other lanes exactly 0.
    out_ref[...] = jnp.dot(h, w3, preferred_element_type=jnp.float32) + b3


# ----------------------------- parameter setup ------------------------------

def init_linear_params(key, fan_in, fan_out):
    """nn.Linear-style init: U(-1/sqrt(fan_in), 1/sqrt(fan_in)). W is (in, out)."""
    kw, kb = jax.random.split(key)
    bound = 1.0 / jnp.sqrt(jnp.float32(fan_in))
    w = jax.random.uniform(kw, (fan_in, fan_out), jnp.float32, -bound, bound)
    b = jax.random.uniform(kb, (fan_out,), jnp.float32, -bound, bound)
    return w, b


def init_critic_params(key, state_dim, action_dim, hidden_dim_q1, hidden_dim_q2):
    in_dim = state_dim + action_dim
    keys = jax.random.split(key, 6)
    w1a, b1a = init_linear_params(keys[0], in_dim, hidden_dim_q1[0])
    w2a, b2a = init_linear_params(keys[1], hidden_dim_q1[0], hidden_dim_q1[1])
    w3a, b3a = init_linear_params(keys[2], hidden_dim_q1[1], 1)
    w1b, b1b = init_linear_params(keys[3], in_dim, hidden_dim_q2[0])
    w2b, b2b = init_linear_params(keys[4], hidden_dim_q2[0], hidden_dim_q2[1])
    w3b, b3b = init_linear_params(keys[5], hidden_dim_q2[1], 1)
    return (w1a, b1a, w2a, b2a, w3a, b3a, w1b, b1b, w2b, b2b, w3b, b3b)


def pack_critic_params(raw, state_dim, action_dim, hidden_dim_q1, hidden_dim_q2):
    """Pack both heads into a single lane-dense, block-diagonal (rows, 128) slab.

    Done once at init time (outside the hot path). Off-diagonal / padding
    entries are exact zeros, preserving Q1/Q2 independence.
    """
    (w1a, b1a, w2a, b2a, w3a, b3a, w1b, b1b, w2b, b2b, w3b, b3b) = raw
    h1a, h2a = hidden_dim_q1
    h1b, h2b = hidden_dim_q2
    c1 = h1a + h1b      # fused width after layer 1
    c2 = h2a + h2b      # fused width after layer 2
    assert c1 <= LANES and c2 <= LANES, "fused hidden width must fit in 128 lanes"

    layout, rows = _slab_layout(state_dim, action_dim)
    slab = jnp.zeros((rows, LANES), jnp.float32)

    # Layer 1 (split into state rows / action rows; Q1 -> lanes [0:h1a), Q2 -> [h1a:c1)).
    slab = slab.at[layout["w1s"]:layout["w1s"] + state_dim, 0:h1a].set(w1a[:state_dim])
    slab = slab.at[layout["w1s"]:layout["w1s"] + state_dim, h1a:c1].set(w1b[:state_dim])
    slab = slab.at[layout["w1a"]:layout["w1a"] + action_dim, 0:h1a].set(w1a[state_dim:])
    slab = slab.at[layout["w1a"]:layout["w1a"] + action_dim, h1a:c1].set(w1b[state_dim:])
    slab = slab.at[layout["b1"], 0:h1a].set(b1a)
    slab = slab.at[layout["b1"], h1a:c1].set(b1b)

    # Layer 2: block diagonal.
    slab = slab.at[layout["w2"]:layout["w2"] + h1a, 0:h2a].set(w2a)
    slab = slab.at[layout["w2"] + h1a:layout["w2"] + c1, h2a:c2].set(w2b)
    slab = slab.at[layout["b2"], 0:h2a].set(b2a)
    slab = slab.at[layout["b2"], h2a:c2].set(b2b)

    # Layer 3: Q1 -> lane 0, Q2 -> lane 1.
    slab = slab.at[layout["w3"]:layout["w3"] + h2a, 0].set(w3a[:, 0])
    slab = slab.at[layout["w3"] + h2a:layout["w3"] + c2, 1].set(w3b[:, 0])
    slab = slab.at[layout["b3"], 0].set(b3a[0])
    slab = slab.at[layout["b3"], 1].set(b3b[0])
    return slab


# --------------------------------- forward ----------------------------------

@jax.jit
def critic_forward(state, action, slab):
    """Equivalent of Critic.forward: returns (q1, q2), each (B, 1)."""
    B, state_dim = state.shape
    action_dim = action.shape[1]
    layout, rows = _slab_layout(state_dim, action_dim)
    assert slab.shape == (rows, LANES)

    kernel = functools.partial(
        _twin_critic_kernel,
        layout=layout, state_dim=state_dim, action_dim=action_dim,
    )
    vmem = pl.BlockSpec(memory_space=pltpu.MemorySpace.VMEM)

    out = pl.pallas_call(
        kernel,
        out_shape=jax.ShapeDtypeStruct((B, LANES), jnp.float32),
        in_specs=[vmem, vmem, vmem],     # state, action, packed param slab: 3 DMAs total
        out_specs=vmem,                  # one lane-dense (B, 128) output store
    )(state, action, slab)

    q1 = out[:, 0:1]
    q2 = out[:, 1:2]
    return q1, q2


# -------------------------------- reference ---------------------------------

def _reference_forward(state, action, raw):
    """Pure-JAX reference mirroring the PyTorch module semantics."""
    (w1a, b1a, w2a, b2a, w3a, b3a, w1b, b1b, w2b, b2b, w3b, b3b) = raw
    sa = jnp.concatenate([state, action], axis=1)
    h1 = jnp.maximum(sa @ w1a + b1a, 0.0)
    h1 = jnp.maximum(h1 @ w2a + b2a, 0.0)
    q1 = h1 @ w3a + b3a
    h2 = jnp.maximum(sa @ w1b + b1b, 0.0)
    h2 = jnp.maximum(h2 @ w2b + b2b, 0.0)
    q2 = h2 @ w3b + b3b
    return q1[:, None] if q1.ndim == 1 else q1, q2[:, None] if q2.ndim == 1 else q2


if __name__ == "__main__":
    # Small shapes consistent with the module's forward.
    batch = 2
    state_dim = 12
    action_dim = 4
    hidden_dim_q1 = [32, 32]
    hidden_dim_q2 = [32, 32]

    key = jax.random.PRNGKey(0)
    k_state, k_action, k_params = jax.random.split(key, 3)

    state = jax.random.normal(k_state, (batch, state_dim), jnp.float32)
    action = jax.random.normal(k_action, (batch, action_dim), jnp.float32)

    raw = init_critic_params(k_params, state_dim, action_dim, hidden_dim_q1, hidden_dim_q2)
    slab = pack_critic_params(raw, state_dim, action_dim, hidden_dim_q1, hidden_dim_q2)
    slab = jax.block_until_ready(slab)   # packing happens once, outside the hot path

    q1, q2 = critic_forward(state, action, slab)
    jax.block_until_ready((q1, q2))

    # Correctness vs. pure-JAX reference (matches PyTorch x @ W.T + b semantics).
    r1, r2 = _reference_forward(state, action, raw)
    r1 = r1.reshape(batch, 1)
    r2 = r2.reshape(batch, 1)
    assert q1.shape == (batch, 1) and q2.shape == (batch, 1)
    assert jnp.allclose(q1, r1, atol=1e-4, rtol=1e-4), "Q1 mismatch vs reference"
    assert jnp.allclose(q2, r2, atol=1e-4, rtol=1e-4), "Q2 mismatch vs reference"

    print("KERNEL_OK")
</pallas_src>

<mosaic_0001>
module attributes {stable_mosaic.version = 11 : i64} {
  func.func @_twin_critic_kernel(%arg0: memref<2x12xf32, #tpu.memory_space<vmem>>, %arg1: memref<2x4xf32, #tpu.memory_space<vmem>>, %arg2: memref<304x128xf32, #tpu.memory_space<vmem>>, %arg3: memref<2x128xf32, #tpu.memory_space<vmem>>) attributes {dimension_semantics = [], scalar_prefetch = 0 : i64, scratch_operands = 0 : i64, tpu.core_type = #tpu.core_type<tc>} {
    %c0 = arith.constant 0 : index
    %c0_0 = arith.constant 0 : index
    %0 = vector.load %arg0[%c0, %c0_0] : memref<2x12xf32, #tpu.memory_space<vmem>>, vector<2x12xf32>
    %c0_1 = arith.constant 0 : index
    %c0_2 = arith.constant 0 : index
    %1 = vector.load %arg1[%c0_1, %c0_2] : memref<2x4xf32, #tpu.memory_space<vmem>>, vector<2x4xf32>
    %c0_3 = arith.constant 0 : index
    %c0_4 = arith.constant 0 : index
    %2 = vector.load %arg2[%c0_3, %c0_4] : memref<304x128xf32, #tpu.memory_space<vmem>>, vector<12x128xf32>
    %c16 = arith.constant 16 : index
    %c0_5 = arith.constant 0 : index
    %3 = vector.load %arg2[%c16, %c0_5] : memref<304x128xf32, #tpu.memory_space<vmem>>, vector<4x128xf32>
    %c24 = arith.constant 24 : index
    %c0_6 = arith.constant 0 : index
    %4 = vector.load %arg2[%c24, %c0_6] : memref<304x128xf32, #tpu.memory_space<vmem>>, vector<1x128xf32>
    %c32 = arith.constant 32 : index
    %c0_7 = arith.constant 0 : index
    %5 = vector.load %arg2[%c32, %c0_7] : memref<304x128xf32, #tpu.memory_space<vmem>>, vector<128x128xf32>
    %c160 = arith.constant 160 : index
    %c0_8 = arith.constant 0 : index
    %6 = vector.load %arg2[%c160, %c0_8] : memref<304x128xf32, #tpu.memory_space<vmem>>, vector<1x128xf32>
    %c168 = arith.constant 168 : index
    %c0_9 = arith.constant 0 : index
    %7 = vector.load %arg2[%c168, %c0_9] : memref<304x128xf32, #tpu.memory_space<vmem>>, vector<128x128xf32>
    %c296 = arith.constant 296 : index
    %c0_10 = arith.constant 0 : index
    %8 = vector.load %arg2[%c296, %c0_10] : memref<304x128xf32, #tpu.memory_space<vmem>>, vector<1x128xf32>
    %cst = arith.constant dense<0.000000e+00> : vector<2x128xf32>
    %9 = tpu.matmul %0, %2, %cst {dimension_numbers = #tpu.dot_dimension_numbers<[1], [0], [0], [1], [0, 0, 1, 1], [], []>} : vector<2x12xf32>, vector<12x128xf32>, vector<2x128xf32> -> vector<2x128xf32>
    %cst_11 = arith.constant dense<0.000000e+00> : vector<2x128xf32>
    %10 = tpu.matmul %1, %3, %cst_11 {dimension_numbers = #tpu.dot_dimension_numbers<[1], [0], [0], [1], [0, 0, 1, 1], [], []>} : vector<2x4xf32>, vector<4x128xf32>, vector<2x128xf32> -> vector<2x128xf32>
    %11 = arith.addf %9, %10 : vector<2x128xf32>
    %12 = vector.broadcast %4 : vector<1x128xf32> to vector<2x128xf32>
    %13 = arith.addf %11, %12 : vector<2x128xf32>
    %cst_12 = arith.constant 0.000000e+00 : f32
    %14 = vector.broadcast %cst_12 : f32 to vector<2x128xf32>
    %15 = arith.maximumf %13, %14 : vector<2x128xf32>
    %cst_13 = arith.constant dense<0.000000e+00> : vector<2x128xf32>
    %16 = tpu.matmul %15, %5, %cst_13 {dimension_numbers = #tpu.dot_dimension_numbers<[1], [0], [0], [1], [0, 0, 1, 1], [], []>} : vector<2x128xf32>, vector<128x128xf32>, vector<2x128xf32> -> vector<2x128xf32>
    %17 = vector.broadcast %6 : vector<1x128xf32> to vector<2x128xf32>
    %18 = arith.addf %16, %17 : vector<2x128xf32>
    %cst_14 = arith.constant 0.000000e+00 : f32
    %19 = vector.broadcast %cst_14 : f32 to vector<2x128xf32>
    %20 = arith.maximumf %18, %19 : vector<2x128xf32>
    %cst_15 = arith.constant dense<0.000000e+00> : vector<2x128xf32>
    %21 = tpu.matmul %20, %7, %cst_15 {dimension_numbers = #tpu.dot_dimension_numbers<[1], [0], [0], [1], [0, 0, 1, 1], [], []>} : vector<2x128xf32>, vector<128x128xf32>, vector<2x128xf32> -> vector<2x128xf32>
    %22 = vector.broadcast %8 : vector<1x128xf32> to vector<2x128xf32>
    %23 = arith.addf %21, %22 : vector<2x128xf32>
    %c0_16 = arith.constant 0 : index
    %c0_17 = arith.constant 0 : index
    %24 = vector.load %arg3[%c0_16, %c0_17] : memref<2x128xf32, #tpu.memory_space<vmem>>, vector<2x128xf32>
    tpu.vector_store %arg3[%c0_16, %c0_17], %23 {strides = array<i32>} : memref<2x128xf32, #tpu.memory_space<vmem>>, vector<2x128xf32>,
    return
  }
}

</mosaic_0001>

<bundles_post_ra>
// kernel: critic_forward.1
= control target key start
LH: loop header
LB: loop body
LE: loop exit
PB: predicated region body
PF: predicated region fallthrough
CT: control target
= control target key end

     0   :  { %8 = vsyncpa [#allocation3], 0  ;;  %s689_s0 = inlined_call_operand.hbm [shape: f32[2,12], index: 0, kind: input, shape index: {}]   ;;  %s690_s1 = inlined_call_operand.hbm [shape: f32[2,4], index: 1, kind: input, shape index: {}]   ;;  %s691_s2 = inlined_call_operand.hbm [shape: f32[304,128], index: 2, kind: input, shape index: {}]   ;;  %s692_s3 = inlined_call_operand.vmem [shape: f32[2,128], index: 3, kind: output, shape index: {}]  }
   0x1   :  { %9 = vsyncpa [#allocation5], 0  ;;  %s607_s12 = smov [#allocation4]   ;;  %s608_s14 = smov [#allocation2]  }
   0x2   :  { %s26_s13 = sshll.u32 %s607_s12, 4  ;;  %s16_s15 = sshll.u32 %s608_s14, 4  ;;  %s27_s13 = int_to_ptr.vmem [resolvable:$true] %s26_s13  ;;  %s17_s15 = int_to_ptr.vmem [resolvable:$true] %s16_s15 }
   0x3   :  { %s551_s16 = scalar_lea.vmem %s27_s13, 32  ;;  %p556_p1 = scmp.lt.s32.totalorder %s27_s13, %s27_s13 }
   0x4   :  { %p552_p0 = scmp.ne.s32.totalorder %s27_s13, %s551_s16  ;;  %p557_p2 = scmp.lt.s32.totalorder %s551_s16, %s551_s16 }
   0x6   :  { %p558_p3 = por %p557_p2, %p556_p1 }
   0x8   :  { %p559_p4 = pnand %p558_p3, %p552_p0 }
   0xa   :  { %562 = shalt.err (!%p559_p4)
}
   0xb   :  { %29 = dma.hbm_to_vmem [thread:$0]  %s690_s1, 32, %s27_s13, [#allocation5]  }
   0xc   :  { %s571_s19 = scalar_lea.vmem %s17_s15, 32  ;;  %p576_p6 = scmp.lt.s32.totalorder %s17_s15, %s17_s15 }
   0xd   :  { %p572_p5 = scmp.ne.s32.totalorder %s17_s15, %s571_s19  ;;  %p577_p7 = scmp.lt.s32.totalorder %s571_s19, %s571_s19 }
   0xf   :  { %p578_p8 = por %p577_p7, %p576_p6 }
  0x11   :  { %p579_p9 = pnand %p578_p8, %p572_p5 }
  0x13   :  { %582 = shalt.err (!%p579_p9)
}
  0x14   :  { %19 = dma.hbm_to_vmem [thread:$0]  %s689_s0, 32, %s17_s15, [#allocation3]  }
  0x15   :  { %s609_s22 = smov [#allocation6]  }
  0x16   :  { %s35_s23 = sshll.u32 %s609_s22, 4  ;;  %s36_s23 = int_to_ptr.vmem [resolvable:$true] %s35_s23 }
  0x17   :  { %s591_s24 = scalar_lea.vmem %s36_s23, 4864  ;;  %p596_p11 = scmp.lt.s32.totalorder %s36_s23, %s36_s23 }
  0x18   :  { %p592_p10 = scmp.ne.s32.totalorder %s36_s23, %s591_s24  ;;  %p597_p12 = scmp.lt.s32.totalorder %s591_s24, %s591_s24 }
  0x1a   :  { %p598_p13 = por %p597_p12, %p596_p11 }
  0x1c   :  { %p599_p0 = pnand %p598_p13, %p592_p10 }
  0x1e   :  { %602 = shalt.err (!%p599_p0)
}
  0x1f   :  { %s610_s1 = smov 128   ;;  %s611_s25 = smov 8  }
  0x20   :  { %41 = dma.hbm_to_vmem [thread:$0]  %s691_s2, 4864, %s36_s23, [#allocation5], %s610_s1, %s610_s1, %s611_s25  }
  0x21   :  { %603 = dma.done.wait [#allocation3], 32  }
  0x22   :  { %604 = vsyncadd [#allocation3], 4294967264 }
  0x23   :  { %605 = dma.done.wait [#allocation5], 4896  }
  0x24   :  { %606 = vsyncadd [#allocation5], 4294962400  ;;  %v612_v0 = vmov 0.0   ;;  %vm613_vm0 = vmmov 0   ;;  %vm95_vm1 = vcmask 1043456   ;;  %vm91_vm2 = vcmask 31744  }
  0x25   :  { %454 = vmatprep.subr.mxu0 %v612_v0  ;;  %459 = vmatprep.subr.mxu1 %v612_v0  ;;  %v55_v1 = vld [vmem:[#allocation6 + $0x10] sm:$0xf]  ;;  %v54_v2 = vld [vmem:[#allocation6 + $0x8] sm:$0xf]  ;;  %v52_v3 = vld [vmem:[#allocation4] sm:$0x3] }
  0x26   :  { %456 = vmatprep.mubr.msk.f32.mxu0 %vm613_vm0, %v612_v0  ;;  %463 = vmatprep.mubr.msk.f32.mxu1 %vm613_vm0, %v612_v0  ;;  %v53_v4 = vld [vmem:[#allocation6] sm:$0xff]  ;;  %v51_v5 = vld [vmem:[#allocation2] sm:$0x3]  ;;  %vm169_vm3 = vcmask 97280   ;;  %v71_v7 = vld [vmem:[#allocation6 + $0x90] sm:$0xff] }
  0x27   :  { %455 = vmatpush3.msk.msra.mxu0 %vm95_vm1, %v55_v1  ;;  %460 = vmatpush3.msk.msra.mxu1 %vm95_vm1, %v54_v2  ;;  %v72_v6 = vld [vmem:[#allocation6 + $0x98] sm:$0xff]  ;;  %v70_v8 = vld [vmem:[#allocation6 + $0x88] sm:$0xff]  ;;  %v69_v9 = vld [vmem:[#allocation6 + $0x80] sm:$0xff] }
  0x28   :  { %457 = vmatmul.mubr.msk.f32.vlgmr.msra.gmra.mxu0 %vm91_vm2, %v52_v3  ;;  %461 = vmatprep.subr.mxu1 %v612_v0  ;;  %v68_v10 = vld [vmem:[#allocation6 + $0x78] sm:$0xff]  ;;  %v67_v11 = vld [vmem:[#allocation6 + $0x70] sm:$0xff]  ;;  %v66_v12 = vld [vmem:[#allocation6 + $0x68] sm:$0xff] }
  0x29   :  { %462 = vmatpush3.msra.mxu1 %v53_v4  ;;  %466 = vmatprep.subr.mxu0 %v612_v0  ;;  %v65_v13 = vld [vmem:[#allocation6 + $0x60] sm:$0xff]  ;;  %v64_v14 = vld [vmem:[#allocation6 + $0x58] sm:$0xff]  ;;  %v63_v15 = vld [vmem:[#allocation6 + $0x50] sm:$0xff] }
  0x2a   :  { %464 = vmatmul.mubr.msk.f32.vlgmr.msra.gmra.mxu1 %vm169_vm3, %v51_v5  ;;  %467 = vmatpush3.msra.mxu0 %v72_v6  ;;  %v62_v16 = vld [vmem:[#allocation6 + $0x48] sm:$0xff]  ;;  %v61_v17 = vld [vmem:[#allocation6 + $0x40] sm:$0xff]  ;;  %v60_v18 = vld [vmem:[#allocation6 + $0x38] sm:$0xff] }
  0x2b   :  { %468 = vmatprep.subr.mxu0 %v612_v0  ;;  %498 = vmatprep.mubr.msk.f32.mxu0 %vm613_vm0, %v612_v0  ;;  %v59_v19 = vld [vmem:[#allocation6 + $0x30] sm:$0xff]  ;;  %v58_v20 = vld [vmem:[#allocation6 + $0x28] sm:$0xff]  ;;  %v57_v21 = vld [vmem:[#allocation6 + $0x20] sm:$0xff] }
  0x2c   :  { %469 = vmatpush3.msra.mxu0 %v71_v7  ;;  %501 = vmatprep.subr.mxu1 %v612_v0  ;;  %v89_v22 = vld [vmem:[#allocation6 + $0x120] sm:$0xff]  ;;  %v88_v23 = vld [vmem:[#allocation6 + $0x118] sm:$0xff]  ;;  %v87_v24 = vld [vmem:[#allocation6 + $0x110] sm:$0xff] }
  0x2d   :  { %470 = vmatprep.subr.mxu0 %v612_v0  ;;  %533 = vmatprep.mubr.msk.f32.mxu1 %vm613_vm0, %v612_v0  ;;  %v86_v25 = vld [vmem:[#allocation6 + $0x108] sm:$0xff]  ;;  %v85_v26 = vld [vmem:[#allocation6 + $0x100] sm:$0xff]  ;;  %v84_v27 = vld [vmem:[#allocation6 + $0xf8] sm:$0xff] }
  0x2e   :  { %471 = vmatpush3.msra.mxu0 %v70_v8  ;;  %502 = vmatpush3.msra.mxu1 %v89_v22  ;;  %v83_v28 = vld [vmem:[#allocation6 + $0xf0] sm:$0xff]  ;;  %v82_v29 = vld [vmem:[#allocation6 + $0xe8] sm:$0xff]  ;;  %v81_v30 = vld [vmem:[#allocation6 + $0xe0] sm:$0xff] }
  0x2f   :  { %472 = vmatprep.subr.mxu0 %v612_v0  ;;  %503 = vmatprep.subr.mxu1 %v612_v0  ;;  %v80_v31 = vld [vmem:[#allocation6 + $0xd8] sm:$0xff]  ;;  %v79_v32 = vld [vmem:[#allocation6 + $0xd0] sm:$0xff]  ;;  %v78_v33 = vld [vmem:[#allocation6 + $0xc8] sm:$0xff] }
  0x30   :  { %473 = vmatpush3.msra.mxu0 %v69_v9  ;;  %504 = vmatpush3.msra.mxu1 %v88_v23  ;;  %v77_v34 = vld [vmem:[#allocation6 + $0xc0] sm:$0xff]  ;;  %v412_v37 = vld [vmem:[#allocation6 + $0x18] ss:$0 sm:$0xff]  ;;  %v75_v44 = vld [vmem:[#allocation6 + $0xb0] sm:$0xff] }
  0x31   :  { %474 = vmatprep.subr.mxu0 %v612_v0  ;;  %505 = vmatprep.subr.mxu1 %v612_v0  ;;  %v76_v43 = vld [vmem:[#allocation6 + $0xb8] sm:$0xff]  ;;  %v74_v45 = vld [vmem:[#allocation6 + $0xa8] sm:$0xff]  ;;  %v413_v46 = vld [vmem:[#allocation6 + $0xa0] ss:$0 sm:$0xff] }
  0x32   :  { %475 = vmatpush3.msra.mxu0 %v68_v10  ;;  %506 = vmatpush3.msra.mxu1 %v87_v24  ;;  %v414_v51 = vld [vmem:[#allocation6 + $0x128] ss:$0 sm:$0xff] }
  0x33   :  { %476 = vmatprep.subr.mxu0 %v612_v0  ;;  %507 = vmatprep.subr.mxu1 %v612_v0 }
  0x34   :  { %477 = vmatpush3.msra.mxu0 %v67_v11  ;;  %508 = vmatpush3.msra.mxu1 %v86_v25 }
  0x35   :  { %478 = vmatprep.subr.mxu0 %v612_v0  ;;  %509 = vmatprep.subr.mxu1 %v612_v0 }
  0x36   :  { %479 = vmatpush3.msra.mxu0 %v66_v12  ;;  %510 = vmatpush3.msra.mxu1 %v85_v26 }
  0x37   :  { %480 = vmatprep.subr.mxu0 %v612_v0  ;;  %511 = vmatprep.subr.mxu1 %v612_v0 }
  0x38   :  { %481 = vmatpush3.msra.mxu0 %v65_v13  ;;  %512 = vmatpush3.msra.mxu1 %v84_v27 }
  0x39   :  { %482 = vmatprep.subr.mxu0 %v612_v0  ;;  %513 = vmatprep.subr.mxu1 %v612_v0 }
  0x3a   :  { %483 = vmatpush3.msra.mxu0 %v64_v14  ;;  %514 = vmatpush3.msra.mxu1 %v83_v28 }
  0x3b   :  { %484 = vmatprep.subr.mxu0 %v612_v0  ;;  %515 = vmatprep.subr.mxu1 %v612_v0 }
  0x3c   :  { %485 = vmatpush3.msra.mxu0 %v63_v15  ;;  %516 = vmatpush3.msra.mxu1 %v82_v29 }
  0x3d   :  { %486 = vmatprep.subr.mxu0 %v612_v0  ;;  %517 = vmatprep.subr.mxu1 %v612_v0 }
  0x3e   :  { %487 = vmatpush3.msra.mxu0 %v62_v16  ;;  %518 = vmatpush3.msra.mxu1 %v81_v30 }
  0x3f   :  { %488 = vmatprep.subr.mxu0 %v612_v0  ;;  %519 = vmatprep.subr.mxu1 %v612_v0 }
  0x40   :  { %489 = vmatpush3.msra.mxu0 %v61_v17  ;;  %520 = vmatpush3.msra.mxu1 %v80_v31 }
  0x41   :  { %490 = vmatprep.subr.mxu0 %v612_v0  ;;  %521 = vmatprep.subr.mxu1 %v612_v0 }
  0x42   :  { %491 = vmatpush3.msra.mxu0 %v60_v18  ;;  %522 = vmatpush3.msra.mxu1 %v79_v32 }
  0x43   :  { %492 = vmatprep.subr.mxu0 %v612_v0  ;;  %523 = vmatprep.subr.mxu1 %v612_v0 }
  0x44   :  { %493 = vmatpush3.msra.mxu0 %v59_v19  ;;  %524 = vmatpush3.msra.mxu1 %v78_v33 }
  0x45   :  { %494 = vmatprep.subr.mxu0 %v612_v0  ;;  %525 = vmatprep.subr.mxu1 %v612_v0 }
  0x46   :  { %495 = vmatpush3.msra.mxu0 %v58_v20  ;;  %526 = vmatpush3.msra.mxu1 %v77_v34 }
  0x47   :  { %496 = vmatprep.subr.mxu0 %v612_v0  ;;  %527 = vmatprep.subr.mxu1 %v612_v0 }
  0x48   :  { %497 = vmatpush3.msra.mxu0 %v57_v21  ;;  %528 = vmatpush3.msra.mxu1 %v76_v43 }
  0x49   :  { %529 = vmatprep.subr.mxu1 %v612_v0 }
  0x4a   :  { %530 = vmatpush3.msra.mxu1 %v75_v44 }
  0x4b   :  { %531 = vmatprep.subr.mxu1 %v612_v0 }
  0x4c   :  { %532 = vmatpush3.msra.mxu1 %v74_v45 }
  0xe8   :  { %v165_v35 = vpop.f32.mrf.mxu0 }
  0xea   :  { %v458_v36 = vpop.f32.mrf.mxu0  ;;  %v242_v38 = vpop.f32.mrf.mxu1 }
  0xeb   :  { %v243_v39 = vadd.f32 %v242_v38, %v165_v35 }
  0xec   :  { %v465_v40 = vpop.f32.mrf.mxu1 }
  0xed   :  { %v250_v41 = vadd.f32 %v412_v37, %v243_v39 }
  0xef   :  { %v251_v42 = vmax.f32 %v250_v41, 0.0 }
  0xf1   :  { %499 = vmatmul.mubr.f32.vlgmr.msra.gmra.mxu0 %v251_v42 }
 0x1b1   :  { %v322_v47 = vpop.f32.mrf.mxu0 }
 0x1b2   :  { %v323_v48 = vadd.f32 %v413_v46, %v322_v47 }
 0x1b3   :  { %v500_v49 = vpop.f32.mrf.mxu0 }
 0x1b4   :  { %v326_v50 = vmax.f32 %v323_v48, 0.0 }
 0x1b6   :  { %534 = vmatmul.mubr.f32.vlgmr.msra.gmra.mxu1 %v326_v50 }
 0x276   :  { %v397_v52 = vpop.f32.mrf.mxu1 }
 0x277   :  { %v398_v53 = vadd.f32 %v414_v51, %v397_v52 }
 0x278   :  { %v535_v54 = vpop.f32.mrf.mxu1 }
 0x279   :  { %401 = vst [vmem:[%s692_s3] sm:$0x3] %v398_v53 }
 0x27a   :  { %406 = vsyncpa [#allocation3], 1 }
 0x27b   :  { %407 = vsyncpa [#allocation5], 1 }

</bundles_post_ra>
